<compile_context>
chip_gen: v7x
topology: tpu7x:2x2x1
jax: 0.10.0
libtpu: 0.0.40
codegen_flags: <defaults>
</compile_context>

<pallas_src>
import math
from functools import partial

import jax
import jax.numpy as jnp
from jax import lax
from jax.experimental import pallas as pl
from jax.experimental.pallas import tpu as pltpu

VMEM_LIMIT = 32 * 1024 * 1024  # conservative scoped-VMEM budget (valid on v5e/v6e/v7x)


# ------------------------------ tile pickers --------------------------------

def _pick_tile(dim, candidates=(512, 256, 128)):
    """Largest candidate tile that divides `dim`; else the full dim.

    Candidates are multiples of (8, 128) so tiled BlockSpecs always satisfy the
    TPU layout constraint; the full-dim fallback is always legal.
    """
    for c in candidates:
        if dim >= c and dim % c == 0:
            return c
    return dim


def _pick_group_block(num_kv_heads, n_rep, head_dim):
    """# of KV groups per attention grid step so every block's last dim is
    either a multiple of 128 lanes or spans the full array dim."""
    for g in range(1, num_kv_heads + 1):
        if num_kv_heads % g:
            continue
        q_ok = (g * n_rep * head_dim) % 128 == 0 or g == num_kv_heads
        kv_ok = (g * head_dim) % 128 == 0 or g == num_kv_heads
        if q_ok and kv_ok:
            return g
    return num_kv_heads


# --------------------------- tiled linear kernel -----------------------------

def _linear_kernel(x_ref, w_ref, b_ref, o_ref, acc_ref):
    # x: (tm, tk), w: (tk, tn), b: (1, tn); K axis is the innermost grid dim.
    @pl.when(pl.program_id(2) == 0)
    def _init():
        acc_ref[...] = jnp.zeros_like(acc_ref)

    acc_ref[...] += jnp.dot(x_ref[...], w_ref[...],
                            preferred_element_type=jnp.float32)

    @pl.when(pl.program_id(2) == pl.num_programs(2) - 1)
    def _finalize():
        # Bias added once (hoisted out of the K loop).
        o_ref[...] = (acc_ref[...] + b_ref[...].astype(jnp.float32)).astype(o_ref.dtype)


def pallas_linear(x2d, w, b):
    """y = x2d @ w + b, with w already (K, N) and b (N,)."""
    M, K = x2d.shape
    Kw, N = w.shape
    assert Kw == K
    tm = _pick_tile(M)
    tk = _pick_tile(K)
    tn = _pick_tile(N)
    return pl.pallas_call(
        _linear_kernel,
        out_shape=jax.ShapeDtypeStruct((M, N), x2d.dtype),
        grid_spec=pltpu.PrefetchScalarGridSpec(
            num_scalar_prefetch=0,
            grid=(M // tm, N // tn, K // tk),
            in_specs=[
                pl.BlockSpec((tm, tk), lambda i, j, k: (i, k)),
                pl.BlockSpec((tk, tn), lambda i, j, k: (k, j)),
                pl.BlockSpec((1, tn), lambda i, j, k: (0, j)),
            ],
            out_specs=pl.BlockSpec((tm, tn), lambda i, j, k: (i, j)),
            scratch_shapes=[pltpu.VMEM((tm, tn), jnp.float32)],
        ),
        compiler_params=pltpu.CompilerParams(
            dimension_semantics=("parallel", "parallel", "arbitrary"),
            vmem_limit_bytes=VMEM_LIMIT),
    )(x2d, w, b.reshape(1, N))


# ------------------------ fused QKV projection kernel ------------------------

def _fused_qkv_kernel(x_ref, wq_ref, wk_ref, wv_ref, bq_ref, bk_ref, bv_ref,
                      q_ref, k_ref, v_ref, q_acc, k_acc, v_acc):
    # Shared x tile drives all three projections: x read from HBM once per (m, k).
    @pl.when(pl.program_id(1) == 0)
    def _init():
        q_acc[...] = jnp.zeros_like(q_acc)
        k_acc[...] = jnp.zeros_like(k_acc)
        v_acc[...] = jnp.zeros_like(v_acc)

    x = x_ref[...]
    q_acc[...] += jnp.dot(x, wq_ref[...], preferred_element_type=jnp.float32)
    k_acc[...] += jnp.dot(x, wk_ref[...], preferred_element_type=jnp.float32)
    v_acc[...] += jnp.dot(x, wv_ref[...], preferred_element_type=jnp.float32)

    @pl.when(pl.program_id(1) == pl.num_programs(1) - 1)
    def _finalize():
        q_ref[...] = (q_acc[...] + bq_ref[...].astype(jnp.float32)).astype(q_ref.dtype)
        k_ref[...] = (k_acc[...] + bk_ref[...].astype(jnp.float32)).astype(k_ref.dtype)
        v_ref[...] = (v_acc[...] + bv_ref[...].astype(jnp.float32)).astype(v_ref.dtype)


def fused_qkv_projection(x2d, wq, bq, wk, bk, wv, bv):
    """(x@wq+bq, x@wk+bk, x@wv+bv) with one pass over x. Falls back to three
    independent tiled linears if the fused (full-N) tiles would blow VMEM."""
    M, K = x2d.shape
    Nq = wq.shape[1]
    Nl = wk.shape[1]
    tm = _pick_tile(M)
    tk = _pick_tile(K)

    itemsize = jnp.dtype(x2d.dtype).itemsize
    wide = Nq + 2 * Nl
    vmem_est = (2 * itemsize * (tm * tk + tk * wide + wide + tm * wide)  # dbl-buffered IO
                + 4 * tm * wide)                                          # f32 accumulators
    if vmem_est > (VMEM_LIMIT * 3) // 4:
        return (pallas_linear(x2d, wq, bq),
                pallas_linear(x2d, wk, bk),
                pallas_linear(x2d, wv, bv))

    return pl.pallas_call(
        _fused_qkv_kernel,
        out_shape=(jax.ShapeDtypeStruct((M, Nq), x2d.dtype),
                   jax.ShapeDtypeStruct((M, Nl), x2d.dtype),
                   jax.ShapeDtypeStruct((M, Nl), x2d.dtype)),
        grid_spec=pltpu.PrefetchScalarGridSpec(
            num_scalar_prefetch=0,
            grid=(M // tm, K // tk),
            in_specs=[
                pl.BlockSpec((tm, tk), lambda i, k: (i, k)),
                pl.BlockSpec((tk, Nq), lambda i, k: (k, 0)),
                pl.BlockSpec((tk, Nl), lambda i, k: (k, 0)),
                pl.BlockSpec((tk, Nl), lambda i, k: (k, 0)),
                pl.BlockSpec((1, Nq), lambda i, k: (0, 0)),
                pl.BlockSpec((1, Nl), lambda i, k: (0, 0)),
                pl.BlockSpec((1, Nl), lambda i, k: (0, 0)),
            ],
            out_specs=(pl.BlockSpec((tm, Nq), lambda i, k: (i, 0)),
                       pl.BlockSpec((tm, Nl), lambda i, k: (i, 0)),
                       pl.BlockSpec((tm, Nl), lambda i, k: (i, 0))),
            scratch_shapes=[pltpu.VMEM((tm, Nq), jnp.float32),
                            pltpu.VMEM((tm, Nl), jnp.float32),
                            pltpu.VMEM((tm, Nl), jnp.float32)],
        ),
        compiler_params=pltpu.CompilerParams(
            dimension_semantics=("parallel", "arbitrary"),
            vmem_limit_bytes=VMEM_LIMIT),
    )(x2d, wq, wk, wv, bq.reshape(1, Nq), bk.reshape(1, Nl), bv.reshape(1, Nl))


# ----------------------------- attention kernel ------------------------------

def _mla_attn_kernel(q_ref, k_ref, v_ref, o_ref, *, n_rep, head_dim, g_blk):
    # q_ref : (1, tq, g_blk * n_rep * hd)  latent queries, 1/sqrt(hd) pre-folded
    # k_ref : (1, t,  g_blk * hd)          latent keys (shared within each group)
    # v_ref : (1, t,  g_blk * hd)          latent values
    # o_ref : (1, tq, g_blk * n_rep * hd)  latent context (lane-dense layout)
    #
    # TODO(synk): for very long sequences tile the KV axis with an online-softmax
    # (m/l/acc scratch) instead of materializing the full (tq, t) scores.
    for gl in range(g_blk):
        k = k_ref[0, :, gl * head_dim:(gl + 1) * head_dim]            # (t, hd)
        v = v_ref[0, :, gl * head_dim:(gl + 1) * head_dim]            # (t, hd)
        for r in range(n_rep):
            h = gl * n_rep + r
            q = q_ref[0, :, h * head_dim:(h + 1) * head_dim]          # (tq, hd), native dtype
            # scores: contract over the latent dim, no explicit transpose.
            s = lax.dot_general(q, k, (((1,), (1,)), ((), ())),
                                preferred_element_type=jnp.float32)   # (tq, t) f32
            # softmax in f32 (matches F.softmax(..., dtype=torch.float32)).
            s = s - jnp.max(s, axis=-1, keepdims=True)
            e = jnp.exp(s)
            p = e * pl.reciprocal(jnp.sum(e, axis=-1, keepdims=True), approx=True)
            ctx = jnp.dot(p.astype(v.dtype), v,
                          preferred_element_type=jnp.float32)         # (tq, hd)
            o_ref[0, :, h * head_dim:(h + 1) * head_dim] = ctx.astype(o_ref.dtype)


# --------------------------- weight absorption --------------------------------

def _absorb_weights(params, *, num_heads, head_dim, hidden_size):
    """Fold k_up into q_proj and v_up into o_proj (one-time weight prep)."""
    ohd = hidden_size // num_heads
    scale = 1.0 / math.sqrt(head_dim)

    kup = params["k_up_w"].reshape(num_heads, ohd, head_dim)      # (nh, ohd, hd)
    vup = params["v_up_w"].reshape(num_heads, ohd, head_dim)      # (nh, ohd, hd)

    qw = params["q_w"].reshape(num_heads, ohd, hidden_size)       # (nh, ohd, H_in)
    qb = params["q_b"].reshape(num_heads, ohd)

    q_eff_w = (jnp.einsum("hdi,hdc->ihc", qw, kup)
               .reshape(hidden_size, num_heads * head_dim) * scale)
    q_eff_b = (jnp.einsum("hd,hdc->hc", qb, kup)
               .reshape(num_heads * head_dim) * scale)

    ow = params["o_w"].reshape(hidden_size, num_heads, ohd)       # (H_out, nh, ohd)
    o_eff_w = (jnp.einsum("hdc,jhd->hcj", vup, ow)
               .reshape(num_heads * head_dim, hidden_size))

    return q_eff_w, q_eff_b, o_eff_w


# ------------------------------ forward pass ---------------------------------

def mla_attention_forward(x, params, *, num_heads, num_kv_heads, head_dim):
    b, t, H = x.shape
    n_rep = num_heads // num_kv_heads
    latent = num_kv_heads * head_dim

    q_eff_w, q_eff_b, o_eff_w = _absorb_weights(
        params, num_heads=num_heads, head_dim=head_dim, hidden_size=H)

    x2d = x.reshape(b * t, H)

    # Fused Q/K/V projections into latent space: lane-dense (b, t, heads*hd) layouts,
    # x streamed from HBM exactly once.
    q2d, k2d, v2d = fused_qkv_projection(
        x2d,
        q_eff_w, q_eff_b,
        params["k_w"].T, params["k_b"],
        params["v_w"].T, params["v_b"])
    q_lat = q2d.reshape(b, t, num_heads * head_dim)
    k_lat = k2d.reshape(b, t, latent)
    v_lat = v2d.reshape(b, t, latent)

    g_blk = _pick_group_block(num_kv_heads, n_rep, head_dim)
    q_blk_w = g_blk * n_rep * head_dim
    kv_blk_w = g_blk * head_dim
    tq = _pick_tile(t)   # q-tile (innermost grid axis); K/V stay resident across it

    kern = partial(_mla_attn_kernel, n_rep=n_rep, head_dim=head_dim, g_blk=g_blk)
    ctx = pl.pallas_call(
        kern,
        out_shape=jax.ShapeDtypeStruct((b, t, num_heads * head_dim), x.dtype),
        grid=(b, num_kv_heads // g_blk, t // tq),
        in_specs=[
            pl.BlockSpec((1, tq, q_blk_w), lambda bi, gi, qi: (bi, qi, gi)),
            pl.BlockSpec((1, t, kv_blk_w), lambda bi, gi, qi: (bi, 0, gi)),
            pl.BlockSpec((1, t, kv_blk_w), lambda bi, gi, qi: (bi, 0, gi)),
        ],
        out_specs=pl.BlockSpec((1, tq, q_blk_w), lambda bi, gi, qi: (bi, qi, gi)),
        compiler_params=pltpu.CompilerParams(
            dimension_semantics=("parallel", "parallel", "parallel"),
            vmem_limit_bytes=VMEM_LIMIT),
    )(q_lat, k_lat, v_lat)

    # Output projection with v_up absorbed; ctx is already lane-dense — no transpose.
    out2d = pallas_linear(ctx.reshape(b * t, num_heads * head_dim),
                          o_eff_w, params["o_b"])
    return out2d.reshape(b, t, H)


# ---------------------------- pure-JAX reference ------------------------------

def mla_attention_reference(x, params, *, num_heads, num_kv_heads, head_dim):
    b, t, H = x.shape
    ohd = H // num_heads
    n_rep = num_heads // num_kv_heads

    q = x @ params["q_w"].T + params["q_b"]
    k = x @ params["k_w"].T + params["k_b"]
    v = x @ params["v_w"].T + params["v_b"]

    q = q.reshape(b, t, num_heads, ohd)
    kup = params["k_up_w"].reshape(num_heads, ohd, head_dim)
    q = jnp.einsum("bthd,hdc->bhtc", q, kup)                       # (b, nh, t, hd)

    k = k.reshape(b, t, num_kv_heads, head_dim).transpose(0, 2, 1, 3)
    v = v.reshape(b, t, num_kv_heads, head_dim).transpose(0, 2, 1, 3)

    k = jnp.repeat(k, n_rep, axis=1)                               # (b, nh, t, hd)
    vup = params["v_up_w"].reshape(num_kv_heads, n_rep, ohd, head_dim)
    v = jnp.einsum("bhtc,hgdc->bhgtd", v, vup).reshape(b, num_heads, t, ohd)

    s = jnp.einsum("bhqc,bhkc->bhqk", q, k) / math.sqrt(head_dim)
    p = jax.nn.softmax(s.astype(jnp.float32), axis=-1).astype(q.dtype)
    o = jnp.einsum("bhqk,bhkd->bhqd", p, v)
    o = o.transpose(0, 2, 1, 3).reshape(b, t, H)
    return o @ params["o_w"].T + params["o_b"]


# ---------------------------------- main --------------------------------------

if __name__ == "__main__":
    hidden_size = 32
    num_heads = 4
    num_kv_heads = 2
    head_dim = 16          # latent per-head dim
    batch, seq = 2, 8
    latent_dim = num_kv_heads * head_dim
    dtype = jnp.float32

    key = jax.random.PRNGKey(0)
    ks = jax.random.split(key, 9)
    scale = 0.1
    params = {
        # torch Linear convention: weight (out_features, in_features)
        "q_w": scale * jax.random.normal(ks[0], (hidden_size, hidden_size), dtype),
        "q_b": scale * jax.random.normal(ks[1], (hidden_size,), dtype),
        "o_w": scale * jax.random.normal(ks[2], (hidden_size, hidden_size), dtype),
        "o_b": scale * jax.random.normal(ks[3], (hidden_size,), dtype),
        "k_up_w": scale * jax.random.normal(ks[4], (hidden_size, head_dim), dtype),
        "v_up_w": scale * jax.random.normal(ks[5], (hidden_size, head_dim), dtype),
        "k_w": scale * jax.random.normal(ks[6], (latent_dim, hidden_size), dtype),
        "k_b": jnp.zeros((latent_dim,), dtype),
        "v_w": scale * jax.random.normal(ks[7], (latent_dim, hidden_size), dtype),
        "v_b": jnp.zeros((latent_dim,), dtype),
    }

    x = jax.random.normal(ks[8], (batch, seq, hidden_size), dtype)

    out = mla_attention_forward(
        x, params, num_heads=num_heads, num_kv_heads=num_kv_heads, head_dim=head_dim)
    out = jax.block_until_ready(out)

    ref = mla_attention_reference(
        x, params, num_heads=num_heads, num_kv_heads=num_kv_heads, head_dim=head_dim)
    ref = jax.block_until_ready(ref)

    assert out.shape == (batch, seq, hidden_size)
    assert jnp.allclose(out, ref, atol=2e-3, rtol=2e-3), (
        f"max abs err {jnp.max(jnp.abs(out - ref))}")

    print("KERNEL_OK")
</pallas_src>

<mosaic_0001>
module attributes {stable_mosaic.version = 11 : i64} {
  func.func @_fused_qkv_kernel(%arg0: i32, %arg1: i32, %arg2: memref<16x32xf32, #tpu.memory_space<vmem>>, %arg3: memref<32x64xf32, #tpu.memory_space<vmem>>, %arg4: memref<32x32xf32, #tpu.memory_space<vmem>>, %arg5: memref<32x32xf32, #tpu.memory_space<vmem>>, %arg6: memref<1x64xf32, #tpu.memory_space<vmem>>, %arg7: memref<1x32xf32, #tpu.memory_space<vmem>>, %arg8: memref<1x32xf32, #tpu.memory_space<vmem>>, %arg9: memref<16x64xf32, #tpu.memory_space<vmem>>, %arg10: memref<16x32xf32, #tpu.memory_space<vmem>>, %arg11: memref<16x32xf32, #tpu.memory_space<vmem>>, %arg12: memref<16x64xf32, #tpu.memory_space<vmem>>, %arg13: memref<16x32xf32, #tpu.memory_space<vmem>>, %arg14: memref<16x32xf32, #tpu.memory_space<vmem>>) attributes {dimension_semantics = [#tpu.dimension_semantics<parallel>, #tpu.dimension_semantics<arbitrary>], iteration_bounds = array<i64: 1, 1>, scalar_prefetch = 0 : i64, scratch_operands = 3 : i64, tpu.core_type = #tpu.core_type<tc>, window_params = [{transform_indices = @transform_0, window_bounds = array<i64: 16, 32>}, {transform_indices = @transform_1, window_bounds = array<i64: 32, 64>}, {transform_indices = @transform_2, window_bounds = array<i64: 32, 32>}, {transform_indices = @transform_3, window_bounds = array<i64: 32, 32>}, {pipeline_mode = #tpu.pipeline_mode<synchronous>, transform_indices = @transform_4, window_bounds = array<i64: 1, 64>}, {pipeline_mode = #tpu.pipeline_mode<synchronous>, transform_indices = @transform_5, window_bounds = array<i64: 1, 32>}, {pipeline_mode = #tpu.pipeline_mode<synchronous>, transform_indices = @transform_6, window_bounds = array<i64: 1, 32>}, {transform_indices = @transform_7, window_bounds = array<i64: 16, 64>}, {transform_indices = @transform_8, window_bounds = array<i64: 16, 32>}, {transform_indices = @transform_9, window_bounds = array<i64: 16, 32>}]} {
    %c0_i32 = arith.constant 0 : i32
    %0 = arith.cmpi eq, %arg1, %c0_i32 : i32
    %1 = arith.extui %0 : i1 to i32
    %c0_i32_0 = arith.constant 0 : i32
    %2 = arith.cmpi ne, %1, %c0_i32_0 : i32
    scf.if %2 {
      %cst_24 = arith.constant 0.000000e+00 : f32
      %22 = vector.broadcast %cst_24 : f32 to vector<16x64xf32>
      %c0_25 = arith.constant 0 : index
      %c0_26 = arith.constant 0 : index
      %23 = vector.load %arg12[%c0_25, %c0_26] : memref<16x64xf32, #tpu.memory_space<vmem>>, vector<16x64xf32>
      tpu.vector_store %arg12[%c0_25, %c0_26], %22 {strides = array<i32>} : memref<16x64xf32, #tpu.memory_space<vmem>>, vector<16x64xf32>,
      %cst_27 = arith.constant 0.000000e+00 : f32
      %24 = vector.broadcast %cst_27 : f32 to vector<16x32xf32>
      %c0_28 = arith.constant 0 : index
      %c0_29 = arith.constant 0 : index
      %25 = vector.load %arg13[%c0_28, %c0_29] : memref<16x32xf32, #tpu.memory_space<vmem>>, vector<16x32xf32>
      tpu.vector_store %arg13[%c0_28, %c0_29], %24 {strides = array<i32>} : memref<16x32xf32, #tpu.memory_space<vmem>>, vector<16x32xf32>,
      %cst_30 = arith.constant 0.000000e+00 : f32
      %26 = vector.broadcast %cst_30 : f32 to vector<16x32xf32>
      %c0_31 = arith.constant 0 : index
      %c0_32 = arith.constant 0 : index
      %27 = vector.load %arg14[%c0_31, %c0_32] : memref<16x32xf32, #tpu.memory_space<vmem>>, vector<16x32xf32>
      tpu.vector_store %arg14[%c0_31, %c0_32], %26 {strides = array<i32>} : memref<16x32xf32, #tpu.memory_space<vmem>>, vector<16x32xf32>,
    } else {
    }
    %c0 = arith.constant 0 : index
    %c0_1 = arith.constant 0 : index
    %3 = vector.load %arg2[%c0, %c0_1] : memref<16x32xf32, #tpu.memory_space<vmem>>, vector<16x32xf32>
    %c0_2 = arith.constant 0 : index
    %c0_3 = arith.constant 0 : index
    %4 = vector.load %arg12[%c0_2, %c0_3] : memref<16x64xf32, #tpu.memory_space<vmem>>, vector<16x64xf32>
    %c0_4 = arith.constant 0 : index
    %c0_5 = arith.constant 0 : index
    %5 = vector.load %arg3[%c0_4, %c0_5] : memref<32x64xf32, #tpu.memory_space<vmem>>, vector<32x64xf32>
    %cst = arith.constant dense<0.000000e+00> : vector<16x64xf32>
    %6 = tpu.matmul %3, %5, %cst {dimension_numbers = #tpu.dot_dimension_numbers<[1], [0], [0], [1], [0, 0, 1, 1], [], []>} : vector<16x32xf32>, vector<32x64xf32>, vector<16x64xf32> -> vector<16x64xf32>
    %7 = arith.addf %4, %6 : vector<16x64xf32>
    %c0_6 = arith.constant 0 : index
    %c0_7 = arith.constant 0 : index
    %8 = vector.load %arg12[%c0_6, %c0_7] : memref<16x64xf32, #tpu.memory_space<vmem>>, vector<16x64xf32>
    tpu.vector_store %arg12[%c0_6, %c0_7], %7 {strides = array<i32>} : memref<16x64xf32, #tpu.memory_space<vmem>>, vector<16x64xf32>,
    %c0_8 = arith.constant 0 : index
    %c0_9 = arith.constant 0 : index
    %9 = vector.load %arg13[%c0_8, %c0_9] : memref<16x32xf32, #tpu.memory_space<vmem>>, vector<16x32xf32>
    %c0_10 = arith.constant 0 : index
    %c0_11 = arith.constant 0 : index
    %10 = vector.load %arg4[%c0_10, %c0_11] : memref<32x32xf32, #tpu.memory_space<vmem>>, vector<32x32xf32>
    %cst_12 = arith.constant dense<0.000000e+00> : vector<16x32xf32>
    %11 = tpu.matmul %3, %10, %cst_12 {dimension_numbers = #tpu.dot_dimension_numbers<[1], [0], [0], [1], [0, 0, 1, 1], [], []>} : vector<16x32xf32>, vector<32x32xf32>, vector<16x32xf32> -> vector<16x32xf32>
    %12 = arith.addf %9, %11 : vector<16x32xf32>
    %c0_13 = arith.constant 0 : index
    %c0_14 = arith.constant 0 : index
    %13 = vector.load %arg13[%c0_13, %c0_14] : memref<16x32xf32, #tpu.memory_space<vmem>>, vector<16x32xf32>
    tpu.vector_store %arg13[%c0_13, %c0_14], %12 {strides = array<i32>} : memref<16x32xf32, #tpu.memory_space<vmem>>, vector<16x32xf32>,
    %c0_15 = arith.constant 0 : index
    %c0_16 = arith.constant 0 : index
    %14 = vector.load %arg14[%c0_15, %c0_16] : memref<16x32xf32, #tpu.memory_space<vmem>>, vector<16x32xf32>
    %c0_17 = arith.constant 0 : index
    %c0_18 = arith.constant 0 : index
    %15 = vector.load %arg5[%c0_17, %c0_18] : memref<32x32xf32, #tpu.memory_space<vmem>>, vector<32x32xf32>
    %cst_19 = arith.constant dense<0.000000e+00> : vector<16x32xf32>
    %16 = tpu.matmul %3, %15, %cst_19 {dimension_numbers = #tpu.dot_dimension_numbers<[1], [0], [0], [1], [0, 0, 1, 1], [], []>} : vector<16x32xf32>, vector<32x32xf32>, vector<16x32xf32> -> vector<16x32xf32>
    %17 = arith.addf %14, %16 : vector<16x32xf32>
    %c0_20 = arith.constant 0 : index
    %c0_21 = arith.constant 0 : index
    %18 = vector.load %arg14[%c0_20, %c0_21] : memref<16x32xf32, #tpu.memory_space<vmem>>, vector<16x32xf32>
    tpu.vector_store %arg14[%c0_20, %c0_21], %17 {strides = array<i32>} : memref<16x32xf32, #tpu.memory_space<vmem>>, vector<16x32xf32>,
    %c0_i32_22 = arith.constant 0 : i32
    %19 = arith.cmpi eq, %arg1, %c0_i32_22 : i32
    %20 = arith.extui %19 : i1 to i32
    %c0_i32_23 = arith.constant 0 : i32
    %21 = arith.cmpi ne, %20, %c0_i32_23 : i32
    scf.if %21 {
      %c0_24 = arith.constant 0 : index
      %c0_25 = arith.constant 0 : index
      %22 = vector.load %arg12[%c0_24, %c0_25] : memref<16x64xf32, #tpu.memory_space<vmem>>, vector<16x64xf32>
      %c0_26 = arith.constant 0 : index
      %c0_27 = arith.constant 0 : index
      %23 = vector.load %arg6[%c0_26, %c0_27] : memref<1x64xf32, #tpu.memory_space<vmem>>, vector<1x64xf32>
      %24 = vector.broadcast %23 : vector<1x64xf32> to vector<16x64xf32>
      %25 = arith.addf %22, %24 : vector<16x64xf32>
      %c0_28 = arith.constant 0 : index
      %c0_29 = arith.constant 0 : index
      %26 = vector.load %arg9[%c0_28, %c0_29] : memref<16x64xf32, #tpu.memory_space<vmem>>, vector<16x64xf32>
      tpu.vector_store %arg9[%c0_28, %c0_29], %25 {strides = array<i32>} : memref<16x64xf32, #tpu.memory_space<vmem>>, vector<16x64xf32>,
      %c0_30 = arith.constant 0 : index
      %c0_31 = arith.constant 0 : index
      %27 = vector.load %arg13[%c0_30, %c0_31] : memref<16x32xf32, #tpu.memory_space<vmem>>, vector<16x32xf32>
      %c0_32 = arith.constant 0 : index
      %c0_33 = arith.constant 0 : index
      %28 = vector.load %arg7[%c0_32, %c0_33] : memref<1x32xf32, #tpu.memory_space<vmem>>, vector<1x32xf32>
      %29 = vector.broadcast %28 : vector<1x32xf32> to vector<16x32xf32>
      %30 = arith.addf %27, %29 : vector<16x32xf32>
      %c0_34 = arith.constant 0 : index
      %c0_35 = arith.constant 0 : index
      %31 = vector.load %arg10[%c0_34, %c0_35] : memref<16x32xf32, #tpu.memory_space<vmem>>, vector<16x32xf32>
      tpu.vector_store %arg10[%c0_34, %c0_35], %30 {strides = array<i32>} : memref<16x32xf32, #tpu.memory_space<vmem>>, vector<16x32xf32>,
      %c0_36 = arith.constant 0 : index
      %c0_37 = arith.constant 0 : index
      %32 = vector.load %arg14[%c0_36, %c0_37] : memref<16x32xf32, #tpu.memory_space<vmem>>, vector<16x32xf32>
      %c0_38 = arith.constant 0 : index
      %c0_39 = arith.constant 0 : index
      %33 = vector.load %arg8[%c0_38, %c0_39] : memref<1x32xf32, #tpu.memory_space<vmem>>, vector<1x32xf32>
      %34 = vector.broadcast %33 : vector<1x32xf32> to vector<16x32xf32>
      %35 = arith.addf %32, %34 : vector<16x32xf32>
      %c0_40 = arith.constant 0 : index
      %c0_41 = arith.constant 0 : index
      %36 = vector.load %arg11[%c0_40, %c0_41] : memref<16x32xf32, #tpu.memory_space<vmem>>, vector<16x32xf32>
      tpu.vector_store %arg11[%c0_40, %c0_41], %35 {strides = array<i32>} : memref<16x32xf32, #tpu.memory_space<vmem>>, vector<16x32xf32>,
    } else {
    }
    return
  }
  func.func @transform_0(%arg0: i32, %arg1: i32) -> (i32, i32) {
    %c0_i32 = arith.constant 0 : i32
    return %arg0, %arg1 : i32, i32
  }
  func.func @transform_1(%arg0: i32, %arg1: i32) -> (i32, i32) {
    %c0_i32 = arith.constant 0 : i32
    %c0_i32_0 = arith.constant 0 : i32
    return %arg1, %c0_i32 : i32, i32
  }
  func.func @transform_2(%arg0: i32, %arg1: i32) -> (i32, i32) {
    %c0_i32 = arith.constant 0 : i32
    %c0_i32_0 = arith.constant 0 : i32
    return %arg1, %c0_i32 : i32, i32
  }
  func.func @transform_3(%arg0: i32, %arg1: i32) -> (i32, i32) {
    %c0_i32 = arith.constant 0 : i32
    %c0_i32_0 = arith.constant 0 : i32
    return %arg1, %c0_i32 : i32, i32
  }
  func.func @transform_4(%arg0: i32, %arg1: i32) -> (i32, i32) {
    %c0_i32 = arith.constant 0 : i32
    %c0_i32_0 = arith.constant 0 : i32
    %c0_i32_1 = arith.constant 0 : i32
    return %c0_i32, %c0_i32_0 : i32, i32
  }
  func.func @transform_5(%arg0: i32, %arg1: i32) -> (i32, i32) {
    %c0_i32 = arith.constant 0 : i32
    %c0_i32_0 = arith.constant 0 : i32
    %c0_i32_1 = arith.constant 0 : i32
    return %c0_i32, %c0_i32_0 : i32, i32
  }
  func.func @transform_6(%arg0: i32, %arg1: i32) -> (i32, i32) {
    %c0_i32 = arith.constant 0 : i32
    %c0_i32_0 = arith.constant 0 : i32
    %c0_i32_1 = arith.constant 0 : i32
    return %c0_i32, %c0_i32_0 : i32, i32
  }
  func.func @transform_7(%arg0: i32, %arg1: i32) -> (i32, i32) {
    %c0_i32 = arith.constant 0 : i32
    %c0_i32_0 = arith.constant 0 : i32
    return %arg0, %c0_i32 : i32, i32
  }
  func.func @transform_8(%arg0: i32, %arg1: i32) -> (i32, i32) {
    %c0_i32 = arith.constant 0 : i32
    %c0_i32_0 = arith.constant 0 : i32
    return %arg0, %c0_i32 : i32, i32
  }
  func.func @transform_9(%arg0: i32, %arg1: i32) -> (i32, i32) {
    %c0_i32 = arith.constant 0 : i32
    %c0_i32_0 = arith.constant 0 : i32
    return %arg0, %c0_i32 : i32, i32
  }
}

</mosaic_0001>

<bundles_post_ra>
// kernel: tpu_custom_call.1
= control target key start
LH: loop header
LB: loop body
LE: loop exit
PB: predicated region body
PF: predicated region fallthrough
CT: control target
= control target key end

     0   :  { %15 = vsyncpa [#allocation6], 0  ;;  %s932_s0 = inlined_call_operand.hbm [shape: f32[16,32], index: 0, kind: input, shape index: {}]   ;;  %s933_s1 = inlined_call_operand.hbm [shape: f32[32,64], index: 1, kind: input, shape index: {}]   ;;  %s934_s2 = inlined_call_operand.hbm [shape: f32[32,32], index: 2, kind: input, shape index: {}]   ;;  %s935_s3 = inlined_call_operand.hbm [shape: f32[32,32], index: 3, kind: input, shape index: {}]   ;;  %s936_s4 = inlined_call_operand.vmem [shape: f32[1,64], index: 4, kind: input, shape index: {}]   ;;  %s937_s5 = inlined_call_operand.vmem [shape: f32[1,32], index: 5, kind: input, shape index: {}]   ;;  %s938_s6 = inlined_call_operand.vmem [shape: f32[1,32], index: 6, kind: input, shape index: {}]   ;;  %s939_s7 = inlined_call_operand.hbm [shape: f32[16,64], index: 7, kind: output, shape index: {0}]   ;;  %s940_s8 = inlined_call_operand.hbm [shape: f32[16,32], index: 8, kind: output, shape index: {1}]   ;;  %s941_s9 = inlined_call_operand.hbm [shape: f32[16,32], index: 9, kind: output, shape index: {2}]  }
   0x1   :  { %16 = vsyncpa [#allocation9], 0 }
   0x2   :  { %17 = vsyncpa [#allocation12], 0 }
   0x3   :  { %18 = vsyncpa [#allocation7], 0 }
   0x4   :  { %19 = vsyncpa [#allocation15], 0  ;;  %s713_s30 = smov [#allocation8]   ;;  %s714_s11 = smov [#allocation5]  }
   0x5   :  { %s37_s10 = sshll.u32 %s713_s30, 4  ;;  %s25_s12 = sshll.u32 %s714_s11, 4  ;;  %s38_s10 = int_to_ptr.vmem [resolvable:$true] %s37_s10  ;;  %s773_s12 = int_to_ptr.vmem [resolvable:$true] %s25_s12 }
   0x6   :  { %s549_s15 = scalar_lea.hbm %s933_s1, 512 }
   0x7   :  { %p550_p0 = scmp.ne.s32.totalorder %s933_s1, %s549_s15  ;;  %p553_p1 = scmp.lt.u32.totalorder %s549_s15, %s933_s1 }
   0x9   :  { %p555_p2 = pnand %p553_p1, %p550_p0 }
   0xb   :  { %558 = shalt.err (!%p555_p2)
}
   0xc   :  { %s559_s20 = scalar_lea.vmem %s38_s10, 512  ;;  %p564_p4 = scmp.lt.s32.totalorder %s38_s10, %s38_s10 }
   0xd   :  { %p560_p3 = scmp.ne.s32.totalorder %s38_s10, %s559_s20  ;;  %p565_p5 = scmp.lt.s32.totalorder %s559_s20, %s559_s20 }
   0xf   :  { %p566_p6 = por %p565_p5, %p564_p4 }
  0x11   :  { %p567_p7 = pnand %p566_p6, %p560_p3 }
  0x13   :  { %570 = shalt.err (!%p567_p7)
}
  0x14   :  { %s715_s21 = smov 128   ;;  %s716_s22 = smov 8  }
  0x15   :  { %43 = dma.hbm_to_vmem [thread:$0]  %s933_s1, 512, %s38_s10, [#allocation9], %s715_s21, %s715_s21, %s716_s22  }
  0x16   :  { %s571_s27 = scalar_lea.hbm %s932_s0, 256 }
  0x17   :  { %p572_p8 = scmp.ne.s32.totalorder %s932_s0, %s571_s27  ;;  %p575_p9 = scmp.lt.u32.totalorder %s571_s27, %s932_s0 }
  0x19   :  { %p577_p10 = pnand %p575_p9, %p572_p8 }
  0x1b   :  { %580 = shalt.err (!%p577_p10)
}
  0x1c   :  { %s581_s13 = scalar_lea.vmem %s773_s12, 256  ;;  %p586_p12 = scmp.lt.s32.totalorder %s773_s12, %s773_s12 }
  0x1d   :  { %p582_p11 = scmp.ne.s32.totalorder %s773_s12, %s581_s13  ;;  %p587_p13 = scmp.lt.s32.totalorder %s581_s13, %s581_s13 }
  0x1f   :  { %p588_p0 = por %p587_p13, %p586_p12 }
  0x21   :  { %p589_p1 = pnand %p588_p0, %p582_p11 }
  0x23   :  { %592 = shalt.err (!%p589_p1)
}
  0x24   :  { %31 = dma.hbm_to_vmem [thread:$0]  %s932_s0, 256, %s773_s12, [#allocation6], %s715_s21, %s715_s21, %s716_s22  }
  0x25   :  { %s717_s14 = smov [#allocation10]   ;;  %s718_s16 = smov [#allocation11]  }
  0x26   :  { %s49_s15 = sshll.u32 %s717_s14, 4  ;;  %s61_s17 = sshll.u32 %s718_s16, 4  ;;  %s50_s15 = int_to_ptr.vmem [resolvable:$true] %s49_s15  ;;  %s810_s17 = int_to_ptr.vmem [resolvable:$true] %s61_s17 }
  0x27   :  { %s593_s20 = scalar_lea.hbm %s934_s2, 512 }
  0x28   :  { %p594_p2 = scmp.ne.s32.totalorder %s934_s2, %s593_s20  ;;  %p597_p3 = scmp.lt.u32.totalorder %s593_s20, %s934_s2 }
  0x2a   :  { %p599_p4 = pnand %p597_p3, %p594_p2 }
  0x2c   :  { %602 = shalt.err (!%p599_p4)
}
  0x2d   :  { %s603_s0 = scalar_lea.vmem %s50_s15, 512  ;;  %p608_p6 = scmp.lt.s32.totalorder %s50_s15, %s50_s15 }
  0x2e   :  { %p604_p5 = scmp.ne.s32.totalorder %s50_s15, %s603_s0  ;;  %p609_p7 = scmp.lt.s32.totalorder %s603_s0, %s603_s0 }
  0x30   :  { %p610_p8 = por %p609_p7, %p608_p6 }
  0x32   :  { %p611_p9 = pnand %p610_p8, %p604_p5 }
  0x34   :  { %614 = shalt.err (!%p611_p9)
}
  0x35   :  { %55 = dma.hbm_to_vmem [thread:$0]  %s934_s2, 512, %s50_s15, [#allocation9], %s715_s21, %s715_s21, %s716_s22  }
  0x36   :  { %s615_s30 = scalar_lea.hbm %s935_s3, 512 }
  0x37   :  { %p616_p10 = scmp.ne.s32.totalorder %s935_s3, %s615_s30  ;;  %p619_p11 = scmp.lt.u32.totalorder %s615_s30, %s935_s3 }
  0x39   :  { %p621_p12 = pnand %p619_p11, %p616_p10 }
  0x3b   :  { %624 = shalt.err (!%p621_p12)
}
  0x3c   :  { %s625_s14 = scalar_lea.vmem %s810_s17, 512  ;;  %p630_p0 = scmp.lt.s32.totalorder %s810_s17, %s810_s17 }
  0x3d   :  { %p626_p13 = scmp.ne.s32.totalorder %s810_s17, %s625_s14  ;;  %p631_p1 = scmp.lt.s32.totalorder %s625_s14, %s625_s14 }
  0x3f   :  { %p632_p2 = por %p631_p1, %p630_p0 }
  0x41   :  { %p633_p3 = pnand %p632_p2, %p626_p13 }
  0x43   :  { %636 = shalt.err (!%p633_p3)
}
  0x44   :  { %67 = dma.hbm_to_vmem [thread:$0]  %s935_s3, 512, %s810_s17, [#allocation12], %s715_s21, %s715_s21, %s716_s22  }
  0x45   :  { %703 = dma.done.wait [#allocation6], 256  }
  0x46   :  { %704 = vsyncadd [#allocation6], 4294967040 }
  0x47   :  { %705 = dma.done.wait [#allocation9], 1024  }
  0x48   :  { %706 = vsyncadd [#allocation9], 4294966272 }
  0x49   :  { %707 = dma.done.wait [#allocation12], 512  }
  0x4a   :  { %708 = vsyncadd [#allocation12], 4294966784  ;;  %vm93_vm0 = vcmask 261120   ;;  %vm90_vm1 = vcmask 523264   ;;  %v719_v0 = vmov 0.0   ;;  %v102_v1 = vld [vmem:[#allocation8] sm:$0xff] }
  0x4b   :  { %92 = vst.msk [vmem:[#allocation2 + $0x8] sm:$0xff] %vm90_vm1, %v719_v0  ;;  %91 = vst.msk [vmem:[#allocation2] sm:$0xff] %vm90_vm1, %v719_v0  ;;  %v103_v2 = vld [vmem:[#allocation8 + $0x8] sm:$0xff]  ;;  %v104_v3 = vld [vmem:[#allocation8 + $0x10] sm:$0xff]  ;;  %s720_s19 = smov [#allocation13]   ;;  %s721_s23 = smov [#allocation14]  }
  0x4c   :  { %94 = vst.msk [vmem:[#allocation3] sm:$0xff] %vm93_vm0, %v719_v0  ;;  %95 = vst.msk [vmem:[#allocation3 + $0x8] sm:$0xff] %vm93_vm0, %v719_v0  ;;  %v515_v4 = vpack.c.bf16 %v103_v2, %v102_v1  ;;  %v105_v5 = vld [vmem:[#allocation8 + $0x18] sm:$0xff]  ;;  %v195_v6 = vld [vmem:[#allocation10] sm:$0xff]  ;;  %s410_s20 = sshll.u32 %s720_s19, 4  ;;  %s422_s24 = sshll.u32 %s721_s23, 4  ;;  %s411_s20 = int_to_ptr.vmem [resolvable:$true] %s410_s20  ;;  %s871_s24 = int_to_ptr.vmem [resolvable:$true] %s422_s24 }
  0x4d   :  { %96 = vst.msk [vmem:[#allocation4] sm:$0xff] %vm93_vm0, %v719_v0  ;;  %97 = vst.msk [vmem:[#allocation4 + $0x8] sm:$0xff] %vm93_vm0, %v719_v0  ;;  %v196_v7 = vld [vmem:[#allocation10 + $0x8] sm:$0xff]  ;;  %v519_v8 = vpack.c.bf16 %v105_v5, %v104_v3  ;;  %v98_v10 = vld [vmem:[#allocation5] sm:$0xff]  ;;  %s637_s25 = scalar_lea.vmem %s411_s20, 256  ;;  %p642_p5 = scmp.lt.s32.totalorder %s411_s20, %s411_s20 }
  0x4e   :  { %v523_v9 = vpack.c.bf16 %v196_v7, %v195_v6  ;;  %v280_v11 = vld [vmem:[#allocation11] sm:$0xff]  ;;  %516 = vmatprep.subr.bf16.mxu0 %v515_v4  ;;  %490 = vmatprep.mubr.msk.f32.mxu0 %vm93_vm0, %v98_v10  ;;  %v281_v12 = vld [vmem:[#allocation11 + $0x8] sm:$0xff]  ;;  %v197_v13 = vld [vmem:[#allocation10 + $0x10] sm:$0xff]  ;;  %p638_p4 = scmp.ne.s32.totalorder %s411_s20, %s637_s25  ;;  %p643_p6 = scmp.lt.s32.totalorder %s637_s25, %s637_s25 }
  0x4f   :  { %v198_v14 = vld [vmem:[#allocation10 + $0x18] sm:$0xff]  ;;  %518 = vmatpush3.bf16.msra.mxu0 %v515_v4  ;;  %v531_v16 = vpack.c.bf16 %v281_v12, %v280_v11  ;;  %v282_v17 = vld [vmem:[#allocation11 + $0x10] sm:$0xff]  ;;  %501 = vmatprep.mubr.msk.f32.mxu1 %vm93_vm0, %v98_v10  ;;  %v461_v36 = vld [vmem:[%s936_s4] ss:$0 sm:$0xff] }
  0x50   :  { %524 = vmatprep.subr.bf16.mxu1 %v523_v9  ;;  %v527_v15 = vpack.c.bf16 %v198_v14, %v197_v13  ;;  %520 = vmatprep.subr.bf16.mxu0 %v519_v8  ;;  %v283_v18 = vld [vmem:[#allocation11 + $0x18] sm:$0xff]  ;;  %v462_v39 = vld [vmem:[%s937_s5] ss:$0 sm:$0xff]  ;;  %p644_p7 = por %p643_p6, %p642_p5 }
  0x51   :  { %526 = vmatpush3.bf16.msra.mxu1 %v523_v9  ;;  %v99_v19 = vld [vmem:[#allocation5 + $0x8] sm:$0xff]  ;;  %v535_v20 = vpack.c.bf16 %v283_v18, %v282_v17  ;;  %v463_v49 = vld [vmem:[%s938_s6] ss:$0 sm:$0xff] }
  0x52   :  { %528 = vmatprep.subr.bf16.mxu1 %v527_v15  ;;  %v101_v21 = vld [vmem:[#allocation2 + $0x8] sm:$0xff]  ;;  %v100_v22 = vld [vmem:[#allocation2] sm:$0xff]  ;;  %p645_p8 = pnand %p644_p7, %p638_p4 }
  0x53   :  { %522 = vmatpush3.bf16.msra.mxu0 %v519_v8  ;;  %v194_v23 = vld [vmem:[#allocation3 + $0x8] sm:$0xff]  ;;  %v193_v25 = vld [vmem:[#allocation3] sm:$0xff] }
  0x54   :  { %532 = vmatprep.subr.bf16.mxu0 %v531_v16  ;;  %v279_v33 = vld [vmem:[#allocation4 + $0x8] sm:$0xff]  ;;  %v278_v34 = vld [vmem:[#allocation4] sm:$0xff] }
  0x55   :  { %530 = vmatpush3.bf16.msra.mxu1 %v527_v15 }
  0x56   :  { %491 = vmatmul.mubr.msk.f32.vlgmr.msra.gmra.mrb[0].mxu0 %vm93_vm0, %v99_v19 }
  0x57   :  { %534 = vmatpush3.bf16.msra.mxu0 %v531_v16  ;;  %512 = vmatprep.mubr.msk.f32.mxu0 %vm93_vm0, %v98_v10 }
  0x58   :  { %502 = vmatmul.mubr.msk.f32.vlgmr.msra.gmra.mrb[0].mxu1 %vm93_vm0, %v99_v19  ;;  %536 = vmatprep.subr.bf16.mxu0 %v535_v20 }
  0x5b   :  { %538 = vmatpush3.bf16.msra.mxu0 %v535_v20 }
  0x5e   :  { %513 = vmatmul.mubr.msk.f32.vlgmr.msra.gmra.mrb[2].mxu0 %vm93_vm0, %v99_v19 }
 0x129   :  { %v492_v24 = vpop.f32.mrb[0].mxu0 }
 0x12a   :  { %v189_v26 = vadd.f32 %v492_v24, %v101_v21  ;;  %v179_v27 = vpop.f32.mrb[1].mxu0 }
 0x12b   :  { %v503_v28 = vpop.f32.mrb[0].mxu1  ;;  %v188_v29 = vadd.f32 %v179_v27, %v100_v22 }
 0x12c   :  { %v275_v30 = vadd.f32 %v503_v28, %v194_v23  ;;  %v265_v31 = vpop.f32.mrb[1].mxu1  ;;  %192 = vst.msk [vmem:[#allocation2 + $0x8] sm:$0xff] %vm90_vm1, %v189_v26 }
 0x12d   :  { %v274_v32 = vadd.f32 %v265_v31, %v193_v25  ;;  %191 = vst.msk [vmem:[#allocation2] sm:$0xff] %vm90_vm1, %v188_v29 }
 0x12e   :  { %277 = vst.msk [vmem:[#allocation3 + $0x8] sm:$0xff] %vm93_vm0, %v275_v30 }
 0x12f   :  { %276 = vst.msk [vmem:[#allocation3] sm:$0xff] %vm93_vm0, %v274_v32 }
 0x131   :  { %v514_v35 = vpop.f32.mrb[2].mxu0 }
 0x132   :  { %v360_v37 = vadd.f32 %v514_v35, %v279_v33  ;;  %v350_v38 = vpop.f32.mrb[3].mxu0 }
 0x133   :  { %v359_v40 = vadd.f32 %v350_v38, %v278_v34  ;;  %v367_v41 = vld [vmem:[#allocation2 + $0x8] sm:$0xff] }
 0x134   :  { %362 = vst.msk [vmem:[#allocation4 + $0x8] sm:$0xff] %vm93_vm0, %v360_v37  ;;  %v366_v43 = vld [vmem:[#allocation2] sm:$0xff]  ;;  %v376_v44 = vadd.f32 %v461_v36, %v367_v41 }
 0x135   :  { %v380_v42 = vld [vmem:[#allocation3 + $0x8] sm:$0xff]  ;;  %361 = vst.msk [vmem:[#allocation4] sm:$0xff] %vm93_vm0, %v359_v40  ;;  %v375_v47 = vadd.f32 %v461_v36, %v366_v43 }
 0x136   :  { %v379_v45 = vld [vmem:[#allocation3] sm:$0xff]  ;;  %v389_v46 = vadd.f32 %v462_v39, %v380_v42  ;;  %378 = vst.msk [vmem:[#allocation13 + $0x8] sm:$0xff] %vm90_vm1, %v376_v44 }
 0x137   :  { %v388_v48 = vadd.f32 %v462_v39, %v379_v45  ;;  %377 = vst.msk [vmem:[#allocation13] sm:$0xff] %vm90_vm1, %v375_v47 }
 0x138   :  { %391 = vst.msk [vmem:[#allocation14 + $0x8] sm:$0xff] %vm93_vm0, %v389_v46 }
 0x139   :  { %390 = vst.msk [vmem:[#allocation14] sm:$0xff] %vm93_vm0, %v388_v48 }
 0x13a   :  { %648 = shalt.err (!%p645_p8)
}
 0x13b   :  { %s649_s12 = scalar_lea.hbm %s939_s7, 256 }
 0x13c   :  { %p650_p9 = scmp.ne.s32.totalorder %s939_s7, %s649_s12  ;;  %p653_p10 = scmp.lt.u32.totalorder %s649_s12, %s939_s7 }
 0x13e   :  { %p655_p11 = pnand %p653_p10, %p650_p9 }
 0x140   :  { %658 = shalt.err (!%p655_p11)
}
 0x141   :  { %416 = dma.vmem_to_hbm [thread:$0]  %s411_s20, 256, %s939_s7, [#allocation7], %s715_s21, %s715_s21, %s716_s22  }
 0x142   :  { %s659_s13 = scalar_lea.vmem %s871_s24, 256  ;;  %p664_p13 = scmp.lt.s32.totalorder %s871_s24, %s871_s24 }
 0x143   :  { %p660_p12 = scmp.ne.s32.totalorder %s871_s24, %s659_s13  ;;  %p665_p0 = scmp.lt.s32.totalorder %s659_s13, %s659_s13 }
 0x145   :  { %p666_p1 = por %p665_p0, %p664_p13 }
 0x147   :  { %p667_p2 = pnand %p666_p1, %p660_p12 }
 0x149   :  { %670 = shalt.err (!%p667_p2)
}
 0x14a   :  { %s671_s14 = scalar_lea.hbm %s940_s8, 256 }
 0x14b   :  { %p672_p3 = scmp.ne.s32.totalorder %s940_s8, %s671_s14  ;;  %p675_p4 = scmp.lt.u32.totalorder %s671_s14, %s940_s8 }
 0x14d   :  { %p677_p5 = pnand %p675_p4, %p672_p3 }
 0x14f   :  { %680 = shalt.err (!%p677_p5)
}
 0x150   :  { %428 = dma.vmem_to_hbm [thread:$0]  %s871_s24, 256, %s940_s8, [#allocation15], %s715_s21, %s715_s21, %s716_s22   ;;  %v393_v50 = vld [vmem:[#allocation4 + $0x8] sm:$0xff]  ;;  %v392_v51 = vld [vmem:[#allocation4] sm:$0xff] }
 0x151   :  { %s722_s18 = smov [#allocation16]   ;;  %v402_v52 = vadd.f32 %v463_v49, %v393_v50  ;;  %v401_v53 = vadd.f32 %v463_v49, %v392_v51 }
 0x152   :  { %s434_s19 = sshll.u32 %s722_s18, 4  ;;  %s435_s19 = int_to_ptr.vmem [resolvable:$true] %s434_s19 }
 0x153   :  { %404 = vst.msk [vmem:[#allocation16 + $0x8] sm:$0xff] %vm93_vm0, %v402_v52  ;;  %403 = vst.msk [vmem:[#allocation16] sm:$0xff] %vm93_vm0, %v401_v53  ;;  %s681_s20 = scalar_lea.vmem %s435_s19, 256  ;;  %p686_p7 = scmp.lt.s32.totalorder %s435_s19, %s435_s19 }
 0x154   :  { %p682_p6 = scmp.ne.s32.totalorder %s435_s19, %s681_s20  ;;  %p687_p8 = scmp.lt.s32.totalorder %s681_s20, %s681_s20 }
 0x156   :  { %p688_p9 = por %p687_p8, %p686_p7 }
 0x158   :  { %p689_p10 = pnand %p688_p9, %p682_p6 }
 0x15a   :  { %692 = shalt.err (!%p689_p10)
}
 0x15b   :  { %s693_s24 = scalar_lea.hbm %s941_s9, 256 }
 0x15c   :  { %p694_p11 = scmp.ne.s32.totalorder %s941_s9, %s693_s24  ;;  %p697_p12 = scmp.lt.u32.totalorder %s693_s24, %s941_s9 }
 0x15e   :  { %p699_p13 = pnand %p697_p12, %p694_p11 }
 0x160   :  { %702 = shalt.err (!%p699_p13)
}
 0x161   :  { %440 = dma.vmem_to_hbm [thread:$0]  %s435_s19, 256, %s941_s9, [#allocation15], %s715_s21, %s715_s21, %s716_s22  }
 0x162   :  { %709 = dma.done.wait [#allocation7], 256  }
 0x163   :  { %710 = vsyncadd [#allocation7], 4294967040 }
 0x164   :  { %711 = dma.done.wait [#allocation15], 512  }
 0x165   :  { %712 = vsyncadd [#allocation15], 4294966784 }
 0x166   :  { %450 = vsyncpa [#allocation6], 1 }
 0x167   :  { %451 = vsyncpa [#allocation9], 1 }
 0x168   :  { %452 = vsyncpa [#allocation12], 1 }
 0x169   :  { %453 = vsyncpa [#allocation7], 1 }
 0x16a   :  { %454 = vsyncpa [#allocation15], 1 }

</bundles_post_ra>
